<compile_context>
chip_gen: v6e
topology: v6e:2x2x1
jax: 0.10.0
libtpu: 0.0.40
codegen_flags: <defaults>
</compile_context>

<pallas_src>
import functools

import numpy as np
import jax
import jax.numpy as jnp
from jax.experimental import pallas as pl
from jax.experimental.pallas import tpu as pltpu


# --------------------------------------------------------------------------
# Host-side (numpy, cached) construction of the interpolation operators.
# --------------------------------------------------------------------------
@functools.lru_cache(maxsize=None)
def _interp_matrix_np(out_size: int, in_size: int) -> np.ndarray:
    """Row-interpolation matrix W (out_size, in_size) for bilinear resize
    with align_corners=True:  y = W @ x  resamples along the leading axis."""
    if out_size == 1:
        coords = np.zeros((1,), dtype=np.float64)
    else:
        coords = np.arange(out_size, dtype=np.float64) * (in_size - 1) / (out_size - 1)
    lo = np.clip(np.floor(coords).astype(np.int64), 0, in_size - 1)
    hi = np.clip(lo + 1, 0, in_size - 1)
    frac = (coords - lo).astype(np.float32)
    w = np.zeros((out_size, in_size), dtype=np.float32)
    rows = np.arange(out_size)
    np.add.at(w, (rows, lo), 1.0 - frac)
    np.add.at(w, (rows, hi), frac)
    return w


@functools.lru_cache(maxsize=None)
def _kron_operator_np(Ho: int, Wo: int, Hi: int, Wi: int) -> np.ndarray:
    """K with shape (Hi*Wi, Ho*Wo) such that
       resize(src).reshape(-1) == src.reshape(-1) @ K   (bilinear, align_corners)."""
    wh = _interp_matrix_np(Ho, Hi)          # (Ho, Hi)
    ww = _interp_matrix_np(Wo, Wi)          # (Wo, Wi)
    # K[h*Wi + w, o*Wo + v] = Wh[o, h] * Ww[v, w]  ==  kron(Wh.T, Ww.T)
    return np.kron(wh.T, ww.T).astype(np.float32)


# --------------------------------------------------------------------------
# Pallas kernel: out = dst + sum_j (src_j @ K_j), all in one pass.
# --------------------------------------------------------------------------
def _make_fused_kernel(num_srcs: int):
    def kernel(*refs):
        dst_ref = refs[0]
        src_refs = refs[1:1 + num_srcs]
        op_refs = refs[1 + num_srcs:1 + 2 * num_srcs]
        out_ref = refs[1 + 2 * num_srcs]
        acc = dst_ref[...].astype(jnp.float32)
        for s_ref, o_ref in zip(src_refs, op_refs):
            acc += jnp.dot(s_ref[...], o_ref[...],
                           preferred_element_type=jnp.float32)
        out_ref[...] = acc.astype(out_ref.dtype)
    return kernel


def _choose_tile_m(M: int, Do: int, Ktot: int) -> int:
    """Row-tile for the (N*C) axis: multiple of 8, sized against a VMEM
    budget that also fits v7x (64 MiB physical, double-buffered blocks),
    and split so a large grid exposes both v7x TensorCores."""
    if M <= 16:
        return M  # single full block (full-dim blocks need no 8-divisibility)
    # dst + out + concatenated srcs rows, double-buffered, f32
    bytes_per_row = 4 * (4 * Do + 2 * Ktot)
    budget_tm = max(8, (12 << 20) // max(bytes_per_row, 1))
    half = -(-M // 2)
    half = -(-half // 8) * 8
    tm = min(512, budget_tm, half)
    return max(8, (tm // 8) * 8)


@functools.partial(jax.jit, static_argnames=("tile_m",))
def _fused_level(dst, srcs, ops, *, tile_m):
    """out = dst + sum_j bilinear_resize(srcs[j] -> dst spatial size)."""
    N, C, Ho, Wo = dst.shape
    M, Do = N * C, Ho * Wo
    num_srcs = len(srcs)

    dst_flat = dst.reshape(M, Do)
    src_flats = [s.reshape(M, s.shape[2] * s.shape[3]) for s in srcs]

    # Pad the row axis to a multiple of the row tile (zeros contribute zeros).
    Mp = -(-M // tile_m) * tile_m
    if Mp != M:
        pad = Mp - M
        dst_flat = jnp.pad(dst_flat, ((0, pad), (0, 0)))
        src_flats = [jnp.pad(s, ((0, pad), (0, 0))) for s in src_flats]
    grid_m = Mp // tile_m

    in_specs = [pl.BlockSpec((tile_m, Do), lambda m: (m, 0))]
    for s in src_flats:
        kj = s.shape[1]
        in_specs.append(pl.BlockSpec((tile_m, kj), lambda m: (m, 0)))
    for o in ops:
        kj = o.shape[0]
        in_specs.append(pl.BlockSpec((kj, Do), lambda m: (0, 0)))

    out = pl.pallas_call(
        _make_fused_kernel(num_srcs),
        out_shape=jax.ShapeDtypeStruct((Mp, Do), dst.dtype),
        grid=(grid_m,),
        in_specs=in_specs,
        out_specs=pl.BlockSpec((tile_m, Do), lambda m: (m, 0)),
        input_output_aliases={0: 0},  # dst updated in place
        compiler_params=pltpu.CompilerParams(
            dimension_semantics=("parallel",),
            vmem_limit_bytes=48 << 20,
        ),
    )(dst_flat, *src_flats, *ops)

    return out[:M].reshape(N, C, Ho, Wo)
    # NOTE: for very large pyramids (Ho*Wo or sum(Hj*Wj) in the tens of
    # thousands) the kron operators would additionally need K/N tiling;
    # not needed at FPN-scale shapes.


def dense_connect(x):
    """Pallas implementation of DenseConnect.forward on a list of NCHW arrays.

    Semantics of the PyTorch loop are preserved: level i (processed from
    n-2 down to 0) accumulates the resized, *already updated* coarser levels.
    """
    x = list(x)
    n = len(x)
    for i in range(n - 2, -1, -1):
        Ho, Wo = int(x[i].shape[2]), int(x[i].shape[3])
        srcs = tuple(x[j] for j in range(i + 1, n))

        # Match operator dtype to the data for MXU-friendly operands (bf16
        # inputs -> bf16 operands with f32 accumulation in the kernel).
        op_dtype = x[i].dtype if x[i].dtype == jnp.dtype(jnp.bfloat16) else jnp.float32
        ops = tuple(
            jnp.asarray(
                _kron_operator_np(Ho, Wo, int(s.shape[2]), int(s.shape[3])),
                dtype=op_dtype)
            for s in srcs)

        M = int(x[i].shape[0]) * int(x[i].shape[1])
        Ktot = sum(int(s.shape[2]) * int(s.shape[3]) for s in srcs)
        tile_m = _choose_tile_m(M, Ho * Wo, Ktot)

        x[i] = _fused_level(x[i], srcs, ops, tile_m=tile_m)
    return x


# --------------------------------------------------------------------------
# Pure-JAX reference (follows the PyTorch loop exactly).
# --------------------------------------------------------------------------
def _ref_dense_connect(x):
    x = list(x)
    n = len(x)
    for i in range(n - 2, -1, -1):
        for j in range(i + 1, n):
            Ho, Wo = x[i].shape[2], x[i].shape[3]
            Hi, Wi = x[j].shape[2], x[j].shape[3]
            wh = jnp.asarray(_interp_matrix_np(Ho, Hi))
            ww = jnp.asarray(_interp_matrix_np(Wo, Wi))
            up = jnp.einsum('oh,nchw,vw->ncov', wh, x[j], ww)
            x[i] = x[i] + up
    return x


if __name__ == "__main__":
    key = jax.random.PRNGKey(0)
    k0, k1, k2 = jax.random.split(key, 3)
    # FPN-style pyramid: three levels, decreasing spatial resolution.
    x = [
        jax.random.normal(k0, (2, 4, 16, 16), dtype=jnp.float32),
        jax.random.normal(k1, (2, 4, 8, 8), dtype=jnp.float32),
        jax.random.normal(k2, (2, 4, 4, 4), dtype=jnp.float32),
    ]

    out = dense_connect([t for t in x])
    out = [jax.block_until_ready(o) for o in out]

    ref = _ref_dense_connect([t for t in x])
    for o, r in zip(out, ref):
        assert o.shape == r.shape and o.dtype == r.dtype
        assert float(jnp.max(jnp.abs(o - r))) < 1e-4, "mismatch vs reference"

    print("KERNEL_OK")
</pallas_src>

<mosaic_0001>
module attributes {stable_mosaic.version = 11 : i64} {
  func.func @kernel(%arg0: i32, %arg1: memref<8x64xf32, #tpu.memory_space<vmem>>, %arg2: memref<8x16xf32, #tpu.memory_space<vmem>>, %arg3: memref<16x64xf32, #tpu.memory_space<vmem>>, %arg4: memref<8x64xf32, #tpu.memory_space<vmem>>) attributes {dimension_semantics = [#tpu.dimension_semantics<parallel>], iteration_bounds = array<i64: 1>, scalar_prefetch = 0 : i64, scratch_operands = 0 : i64, tpu.core_type = #tpu.core_type<tc>, window_params = [{transform_indices = @transform_0, window_bounds = array<i64: 8, 64>}, {transform_indices = @transform_1, window_bounds = array<i64: 8, 16>}, {pipeline_mode = #tpu.pipeline_mode<synchronous>, transform_indices = @transform_2, window_bounds = array<i64: 16, 64>}, {transform_indices = @transform_3, window_bounds = array<i64: 8, 64>}]} {
    %c0 = arith.constant 0 : index
    %c0_0 = arith.constant 0 : index
    %0 = vector.load %arg1[%c0, %c0_0] : memref<8x64xf32, #tpu.memory_space<vmem>>, vector<8x64xf32>
    %c0_1 = arith.constant 0 : index
    %c0_2 = arith.constant 0 : index
    %1 = vector.load %arg2[%c0_1, %c0_2] : memref<8x16xf32, #tpu.memory_space<vmem>>, vector<8x16xf32>
    %c0_3 = arith.constant 0 : index
    %c0_4 = arith.constant 0 : index
    %2 = vector.load %arg3[%c0_3, %c0_4] : memref<16x64xf32, #tpu.memory_space<vmem>>, vector<16x64xf32>
    %cst = arith.constant dense<0.000000e+00> : vector<8x64xf32>
    %3 = tpu.matmul %1, %2, %cst {dimension_numbers = #tpu.dot_dimension_numbers<[1], [0], [0], [1], [0, 0, 1, 1], [], []>} : vector<8x16xf32>, vector<16x64xf32>, vector<8x64xf32> -> vector<8x64xf32>
    %4 = arith.addf %0, %3 : vector<8x64xf32>
    %c0_5 = arith.constant 0 : index
    %c0_6 = arith.constant 0 : index
    %5 = vector.load %arg4[%c0_5, %c0_6] : memref<8x64xf32, #tpu.memory_space<vmem>>, vector<8x64xf32>
    tpu.vector_store %arg4[%c0_5, %c0_6], %4 {strides = array<i32>} : memref<8x64xf32, #tpu.memory_space<vmem>>, vector<8x64xf32>,
    return
  }
  func.func @transform_0(%arg0: i32) -> (i32, i32) {
    %c0_i32 = arith.constant 0 : i32
    %c0_i32_0 = arith.constant 0 : i32
    return %arg0, %c0_i32 : i32, i32
  }
  func.func @transform_1(%arg0: i32) -> (i32, i32) {
    %c0_i32 = arith.constant 0 : i32
    %c0_i32_0 = arith.constant 0 : i32
    return %arg0, %c0_i32 : i32, i32
  }
  func.func @transform_2(%arg0: i32) -> (i32, i32) {
    %c0_i32 = arith.constant 0 : i32
    %c0_i32_0 = arith.constant 0 : i32
    %c0_i32_1 = arith.constant 0 : i32
    return %c0_i32, %c0_i32_0 : i32, i32
  }
  func.func @transform_3(%arg0: i32) -> (i32, i32) {
    %c0_i32 = arith.constant 0 : i32
    %c0_i32_0 = arith.constant 0 : i32
    return %arg0, %c0_i32 : i32, i32
  }
}

</mosaic_0001>

<bundles_post_ra>
// kernel: _fused_level.1
= control target key start
LH: loop header
LB: loop body
LE: loop exit
PB: predicated region body
PF: predicated region fallthrough
CT: control target
= control target key end

     0   :  { %v112_v0 = vmov 0.0   ;;  %vm113_vm0 = vmmov 0   ;;  %vm18_vm1 = vcmask 130048   ;;  %vm93_vm2 = vcmask 523264   ;;  %s149_s2 = inlined_call_operand.vmem [shape: f32[16,64], index: 2, kind: input, shape index: {}]   ;;  %s150_s1 = inlined_call_operand.vmem [shape: f32[8,16], index: 1, kind: input, shape index: {}]   ;;  %s151_s0 = inlined_call_operand.vmem [shape: f32[8,64], index: 0, kind: input, shape index: {}, may-alias: {0,3}]   ;;  %s152_s3 = inlined_call_operand.vmem [shape: f32[8,64], index: 3, kind: output, shape index: {}, may-alias: {0,3}]  }
   0x1   :  { %103 = vmatprep.subr.mxu0 %v112_v0  ;;  %v17_v1 = vld [vmem:[%s149_s2 + $0x8] sm:$0xff]  ;;  %v16_v2 = vld [vmem:[%s149_s2] sm:$0xff]  ;;  %107 = vmatprep.mubr.msk.f32.mxu0 %vm113_vm0, %v112_v0 }
   0x2   :  { %104 = vmatpush3.msra.mxu0 %v17_v1  ;;  %v15_v3 = vld [vmem:[%s150_s1] sm:$0xff] }
   0x3   :  { %105 = vmatprep.subr.mxu0 %v112_v0  ;;  %v14_v4 = vld [vmem:[%s151_s0] sm:$0xff] }
   0x4   :  { %106 = vmatpush3.msra.mxu0 %v16_v2 }
   0x5   :  { %108 = vmatmul.mubr.msk.f32.vlgmr.msra.gmra.mxu0 %vm18_vm1, %v15_v3 }
  0xc5   :  { %v88_v5 = vpop.f32.mrf.mxu0 }
  0xc6   :  { %v92_v6 = vadd.f32 %v88_v5, %v14_v4 }
  0xc7   :  { %v109_v7 = vpop.f32.mrf.mxu0 }
  0xc8   :  { %94 = vst.msk [vmem:[%s152_s3] sm:$0xff] %vm93_vm2, %v92_v6 }

</bundles_post_ra>
